<compile_context>
chip_gen: v7x
topology: tpu7x:2x2x1
jax: 0.10.0
libtpu: 0.0.40
codegen_flags: <defaults>
</compile_context>

<pallas_src>
import functools

import jax
import jax.numpy as jnp
from jax import lax
from jax.experimental import pallas as pl
from jax.experimental.pallas import tpu as pltpu


def _round_up(x, m):
    return ((x + m - 1) // m) * m


# ------------------------- Pallas kernel (hot path) -------------------------

def _conv_bn_act_kernel(x_ref, w_ref, scale_ref, shift_ref, o_ref, *,
                        k, stride, dilation, rpp, wout_pad, tile_m, m_blocks,
                        use_act):
    """Implicit-im2col conv + f32 BN epilogue + ReLU6 for one (n, cout, m) block.

    x_ref:     (m_in, k*cin)        bf16  kw-packed, W-strided, H-phase-grouped image
    w_ref:     (k, k*cin, tile_co)  bf16  conv weights, one slab per kh tap
    scale_ref: (1, tile_co)         f32   folded BatchNorm scale
    shift_ref: (1, tile_co)         f32   folded BatchNorm shift
    o_ref:     (tile_m, tile_co)    bf16  output rows (hout rows x wout_pad cols)
    """
    if m_blocks == 1:
        base = 0                                   # fully static slices
    else:
        base = pl.multiple_of(pl.program_id(2) * tile_m, tile_m)

    acc = None
    # k shifted sub-matmuls (one per kh tap); all reads are whole-row multiples
    # of wout_pad (a multiple of 8) -> sublane-aligned, no realignment copies.
    for kh in range(k):
        q = kh * dilation
        phase, within = q % stride, q // stride
        off = (phase * rpp + within) * wout_pad     # static Python int
        start = off if m_blocks == 1 else base + off
        lhs = x_ref[pl.ds(start, tile_m), :]        # (tile_m, k*cin) bf16
        part = jnp.dot(lhs, w_ref[kh], preferred_element_type=jnp.float32)
        acc = part if acc is None else acc + part

    y = acc * scale_ref[...] + shift_ref[...]       # BN(eval) in f32
    if use_act:
        y = jnp.clip(y, 0.0, 6.0)                   # ReLU6
    o_ref[...] = y.astype(o_ref.dtype)              # bf16 store (lane-dense, unmasked)


# ------------------------------ glue (JAX) -----------------------------------

def _tf_same_padding(h, w, stride, kernel_size, dilation):
    """TensorFlow-style SAME padding amounts (matches apply_tf_padding)."""
    if h % stride == 0:
        pad_h = max(kernel_size - stride, 0)
    else:
        pad_h = max(kernel_size - h % stride, 0)
    if w % stride == 0:
        pad_w = max(kernel_size - stride, 0)
    else:
        pad_w = max(kernel_size - w % stride, 0)
    pad_left = pad_w // 2
    pad_right = pad_w - pad_left
    pad_top = pad_h // 2
    pad_bottom = pad_h - pad_top
    return (pad_top * dilation, pad_bottom * dilation,
            pad_left * dilation, pad_right * dilation)


def mobilenet_v2_conv_layer(x_nchw, conv_weight, bn_gamma, bn_beta, bn_mean, bn_var,
                            *, stride=1, dilation=1, tf_padding=True,
                            kernel_size=3, eps=1e-3,
                            use_normalization=True, use_activation=True,
                            out_dtype=None, target_tile_m=256, lane=128):
    """Forward pass of MobileNetV2ConvLayer (groups=1, bias=False)."""
    n, cin, h, w = x_nchw.shape
    cout = conv_weight.shape[0]
    k, s, d = kernel_size, stride, dilation
    out_dtype = x_nchw.dtype if out_dtype is None else out_dtype

    # NCHW -> NHWC (channels on lanes).
    # TODO(synk): keep the model NHWC end-to-end to avoid these transposes.
    x = jnp.transpose(x_nchw, (0, 2, 3, 1))

    if tf_padding:
        pt, pb, plft, prt = _tf_same_padding(h, w, s, k, d)
    else:
        p = ((k - 1) // 2) * d
        pt = pb = plft = prt = p
    x = jnp.pad(x, ((0, 0), (pt, pb), (plft, prt), (0, 0)))
    hp, wp = h + pt + pb, w + plft + prt

    hout = (hp - d * (k - 1) - 1) // s + 1
    wout = (wp - d * (k - 1) - 1) // s + 1
    kcin = k * cin

    # ---- pack kw taps (and the W stride) into the channel/lane dim ----------
    cols = [x[:, :, kw * d: kw * d + (wout - 1) * s + 1: s, :] for kw in range(k)]
    x_kw = jnp.concatenate(cols, axis=-1) if k > 1 else cols[0]   # (n, hp, wout, k*cin)

    wout_pad = _round_up(wout, 8)                 # 8-aligned row pitch
    if wout_pad != wout:
        x_kw = jnp.pad(x_kw, ((0, 0), (0, 0), (0, wout_pad - wout), (0, 0)))

    # ---- tiling: output rows (M) and output channels (cout) -----------------
    rpt = min(max(1, target_tile_m // wout_pad), hout)   # output rows per tile
    cout_pad = _round_up(cout, lane)
    tile_cout = min(cout_pad, lane)                       # 128-wide cout tiles
    cout_blocks = cout_pad // tile_cout
    m_blocks = pl.cdiv(hout, rpt)
    if n * cout_blocks * m_blocks < 2 and hout >= 2:      # v7x: feed both TCs
        rpt = pl.cdiv(hout, 2)
        m_blocks = pl.cdiv(hout, rpt)
    hout_pad = rpt * m_blocks
    tile_m = rpt * wout_pad

    # ---- group rows along H by stride phase (identity for stride=1) ---------
    within_max = (d * (k - 1)) // s
    rpp = hout_pad + within_max            # rows allocated per phase group
    total_rows = s * rpp
    cur_rows = x_kw.shape[1]
    if cur_rows < total_rows:
        x_kw = jnp.pad(x_kw, ((0, 0), (0, total_rows - cur_rows), (0, 0), (0, 0)))
    elif cur_rows > total_rows:            # trailing rows are never needed
        x_kw = x_kw[:, :total_rows]
    if s > 1:
        x_kw = x_kw.reshape(n, rpp, s, wout_pad, kcin)
        x_kw = jnp.transpose(x_kw, (0, 2, 1, 3, 4))       # phase-major rows
    m_in = total_rows * wout_pad
    x_flat = x_kw.reshape(n, m_in, kcin).astype(jnp.bfloat16)

    # ---- weights: (Cout, Cin, Kh, Kw) -> (Kh, Kw*Cin, Cout_pad), plain bf16 --
    w_taps = jnp.transpose(conv_weight, (2, 3, 1, 0)).reshape(k, kcin, cout)
    w_taps = jnp.pad(w_taps.astype(jnp.float32),
                     ((0, 0), (0, 0), (0, cout_pad - cout))).astype(jnp.bfloat16)

    # ---- BatchNorm (eval) folded into per-channel f32 scale/shift -----------
    if use_normalization:
        scale = (bn_gamma / jnp.sqrt(bn_var + eps)).astype(jnp.float32)
        shift = (bn_beta - bn_mean * scale).astype(jnp.float32)
    else:
        scale = jnp.ones((cout,), jnp.float32)
        shift = jnp.zeros((cout,), jnp.float32)
    scale_row = jnp.pad(scale, (0, cout_pad - cout)).reshape(1, cout_pad)
    shift_row = jnp.pad(shift, (0, cout_pad - cout)).reshape(1, cout_pad)

    kernel = functools.partial(
        _conv_bn_act_kernel, k=k, stride=s, dilation=d, rpp=rpp,
        wout_pad=wout_pad, tile_m=tile_m, m_blocks=m_blocks,
        use_act=bool(use_activation))

    out_flat = pl.pallas_call(
        kernel,
        out_shape=jax.ShapeDtypeStruct((n, hout_pad * wout_pad, cout_pad),
                                       jnp.bfloat16),
        grid_spec=pltpu.PrefetchScalarGridSpec(
            num_scalar_prefetch=0,
            grid=(n, cout_blocks, m_blocks),
            in_specs=[
                # Whole packed image per batch element; index ignores (ci, mi)
                # so it is DMA'd once per batch element and stays resident.
                pl.BlockSpec((None, m_in, kcin), lambda ni, ci, mi: (ni, 0, 0)),
                pl.BlockSpec((k, kcin, tile_cout), lambda ni, ci, mi: (0, 0, ci)),
                pl.BlockSpec((1, tile_cout), lambda ni, ci, mi: (0, ci)),
                pl.BlockSpec((1, tile_cout), lambda ni, ci, mi: (0, ci)),
            ],
            out_specs=pl.BlockSpec((None, tile_m, tile_cout),
                                   lambda ni, ci, mi: (ni, mi, ci)),
        ),
        compiler_params=pltpu.CompilerParams(
            dimension_semantics=("parallel", "parallel", "parallel"),
            vmem_limit_bytes=32 * 1024 * 1024),
    )(x_flat, w_taps, scale_row, shift_row)

    # Drop padded rows/cols/lanes, back to NCHW, restore caller dtype.
    out = out_flat.reshape(n, hout_pad, wout_pad, cout_pad)[:, :hout, :wout, :cout]
    return jnp.transpose(out, (0, 3, 1, 2)).astype(out_dtype)


# ----------------------------- reference (JAX) --------------------------------

def _reference(x_nchw, conv_weight, bn_gamma, bn_beta, bn_mean, bn_var,
               *, stride, dilation, kernel_size, eps, tf_padding):
    n, cin, h, w = x_nchw.shape
    if tf_padding:
        pt, pb, plft, prt = _tf_same_padding(h, w, stride, kernel_size, dilation)
        pad = ((pt, pb), (plft, prt))
    else:
        p = ((kernel_size - 1) // 2) * dilation
        pad = ((p, p), (p, p))
    y = lax.conv_general_dilated(
        x_nchw, conv_weight, window_strides=(stride, stride), padding=pad,
        rhs_dilation=(dilation, dilation),
        dimension_numbers=("NCHW", "OIHW", "NCHW"))
    scale = (bn_gamma / jnp.sqrt(bn_var + eps)).reshape(1, -1, 1, 1)
    shift = (bn_beta - bn_mean * bn_gamma / jnp.sqrt(bn_var + eps)).reshape(1, -1, 1, 1)
    y = y * scale + shift
    return jnp.clip(y, 0.0, 6.0)


# ---------------------------------- main --------------------------------------

if __name__ == "__main__":
    key = jax.random.PRNGKey(0)
    k_x, k_w, k_g, k_b, k_m, k_v = jax.random.split(key, 6)

    # Small MobileNetV2-style conv layer: 4 -> 8 channels, 3x3, groups=1,
    # bias=False, tf_padding=True, BN(eval) + ReLU6.
    N, CIN, H, W = 2, 4, 16, 16
    COUT, KSIZE, DIL = 8, 3, 1
    EPS = 1e-3

    x = jax.random.normal(k_x, (N, CIN, H, W), jnp.float32)
    conv_w = jax.random.normal(k_w, (COUT, CIN, KSIZE, KSIZE), jnp.float32) * 0.1
    gamma = 1.0 + 0.1 * jax.random.normal(k_g, (COUT,), jnp.float32)
    beta = 0.1 * jax.random.normal(k_b, (COUT,), jnp.float32)
    running_mean = 0.1 * jax.random.normal(k_m, (COUT,), jnp.float32)
    running_var = jax.random.uniform(k_v, (COUT,), jnp.float32, 0.5, 1.5)

    for stride in (1, 2):
        out = mobilenet_v2_conv_layer(
            x, conv_w, gamma, beta, running_mean, running_var,
            stride=stride, dilation=DIL, tf_padding=True, kernel_size=KSIZE,
            eps=EPS, use_normalization=True, use_activation=True)
        out = jax.block_until_ready(out)

        ref = _reference(x, conv_w, gamma, beta, running_mean, running_var,
                         stride=stride, dilation=DIL, kernel_size=KSIZE,
                         eps=EPS, tf_padding=True)
        assert out.shape == ref.shape, (stride, out.shape, ref.shape)
        max_err = float(jnp.max(jnp.abs(out - ref)))
        # bf16 MXU operands + bf16 store (f32 accumulation / BN epilogue)
        # -> relaxed tolerance vs the f32 reference.
        assert jnp.allclose(out, ref, atol=5e-2, rtol=5e-2), (stride, max_err)

    print("KERNEL_OK")
</pallas_src>

<mosaic_0001>
module attributes {stable_mosaic.version = 11 : i64} {
  func.func @_conv_bn_act_kernel(%arg0: i32, %arg1: i32, %arg2: i32, %arg3: memref<1x288x12xbf16, #tpu.memory_space<vmem>>, %arg4: memref<3x12x128xbf16, #tpu.memory_space<vmem>>, %arg5: memref<1x128xf32, #tpu.memory_space<vmem>>, %arg6: memref<1x128xf32, #tpu.memory_space<vmem>>, %arg7: memref<1x256x128xbf16, #tpu.memory_space<vmem>>) attributes {dimension_semantics = [#tpu.dimension_semantics<parallel>, #tpu.dimension_semantics<parallel>, #tpu.dimension_semantics<parallel>], iteration_bounds = array<i64: 2, 1, 1>, scalar_prefetch = 0 : i64, scratch_operands = 0 : i64, tpu.core_type = #tpu.core_type<tc>, window_params = [{transform_indices = @transform_0, window_bounds = array<i64: 1, 288, 12>}, {transform_indices = @transform_1, window_bounds = array<i64: 3, 12, 128>}, {transform_indices = @transform_2, window_bounds = array<i64: 1, 128>}, {transform_indices = @transform_3, window_bounds = array<i64: 1, 128>}, {transform_indices = @transform_4, window_bounds = array<i64: 1, 256, 128>}]} {
    %c0 = arith.constant 0 : index
    %c0_0 = arith.constant 0 : index
    %c0_1 = arith.constant 0 : index
    %0 = vector.load %arg3[%c0, %c0_0, %c0_1] : memref<1x288x12xbf16, #tpu.memory_space<vmem>>, vector<1x256x12xbf16>
    %1 = vector.shape_cast %0 : vector<1x256x12xbf16> to vector<256x12xbf16>
    %c0_2 = arith.constant 0 : index
    %c0_3 = arith.constant 0 : index
    %c0_4 = arith.constant 0 : index
    %2 = vector.load %arg4[%c0_2, %c0_3, %c0_4] : memref<3x12x128xbf16, #tpu.memory_space<vmem>>, vector<1x12x128xbf16>
    %3 = vector.shape_cast %2 : vector<1x12x128xbf16> to vector<12x128xbf16>
    %cst = arith.constant dense<0.000000e+00> : vector<256x128xf32>
    %4 = tpu.matmul %1, %3, %cst {dimension_numbers = #tpu.dot_dimension_numbers<[1], [0], [0], [1], [0, 0, 1, 1], [], []>} : vector<256x12xbf16>, vector<12x128xbf16>, vector<256x128xf32> -> vector<256x128xf32>
    %c0_5 = arith.constant 0 : index
    %c16 = arith.constant 16 : index
    %c0_6 = arith.constant 0 : index
    %5 = vector.load %arg3[%c0_5, %c16, %c0_6] : memref<1x288x12xbf16, #tpu.memory_space<vmem>>, vector<1x256x12xbf16>
    %6 = vector.shape_cast %5 : vector<1x256x12xbf16> to vector<256x12xbf16>
    %c1 = arith.constant 1 : index
    %c0_7 = arith.constant 0 : index
    %c0_8 = arith.constant 0 : index
    %7 = vector.load %arg4[%c1, %c0_7, %c0_8] : memref<3x12x128xbf16, #tpu.memory_space<vmem>>, vector<1x12x128xbf16>
    %8 = vector.shape_cast %7 : vector<1x12x128xbf16> to vector<12x128xbf16>
    %cst_9 = arith.constant dense<0.000000e+00> : vector<256x128xf32>
    %9 = tpu.matmul %6, %8, %cst_9 {dimension_numbers = #tpu.dot_dimension_numbers<[1], [0], [0], [1], [0, 0, 1, 1], [], []>} : vector<256x12xbf16>, vector<12x128xbf16>, vector<256x128xf32> -> vector<256x128xf32>
    %10 = arith.addf %4, %9 : vector<256x128xf32>
    %c0_10 = arith.constant 0 : index
    %c32 = arith.constant 32 : index
    %c0_11 = arith.constant 0 : index
    %11 = vector.load %arg3[%c0_10, %c32, %c0_11] : memref<1x288x12xbf16, #tpu.memory_space<vmem>>, vector<1x256x12xbf16>
    %12 = vector.shape_cast %11 : vector<1x256x12xbf16> to vector<256x12xbf16>
    %c2 = arith.constant 2 : index
    %c0_12 = arith.constant 0 : index
    %c0_13 = arith.constant 0 : index
    %13 = vector.load %arg4[%c2, %c0_12, %c0_13] : memref<3x12x128xbf16, #tpu.memory_space<vmem>>, vector<1x12x128xbf16>
    %14 = vector.shape_cast %13 : vector<1x12x128xbf16> to vector<12x128xbf16>
    %cst_14 = arith.constant dense<0.000000e+00> : vector<256x128xf32>
    %15 = tpu.matmul %12, %14, %cst_14 {dimension_numbers = #tpu.dot_dimension_numbers<[1], [0], [0], [1], [0, 0, 1, 1], [], []>} : vector<256x12xbf16>, vector<12x128xbf16>, vector<256x128xf32> -> vector<256x128xf32>
    %16 = arith.addf %10, %15 : vector<256x128xf32>
    %c0_15 = arith.constant 0 : index
    %c0_16 = arith.constant 0 : index
    %17 = vector.load %arg5[%c0_15, %c0_16] : memref<1x128xf32, #tpu.memory_space<vmem>>, vector<1x128xf32>
    %18 = vector.broadcast %17 : vector<1x128xf32> to vector<256x128xf32>
    %19 = arith.mulf %16, %18 : vector<256x128xf32>
    %c0_17 = arith.constant 0 : index
    %c0_18 = arith.constant 0 : index
    %20 = vector.load %arg6[%c0_17, %c0_18] : memref<1x128xf32, #tpu.memory_space<vmem>>, vector<1x128xf32>
    %21 = vector.broadcast %20 : vector<1x128xf32> to vector<256x128xf32>
    %22 = arith.addf %19, %21 : vector<256x128xf32>
    %cst_19 = arith.constant 0.000000e+00 : f32
    %cst_20 = arith.constant 6.000000e+00 : f32
    %23 = vector.broadcast %cst_19 : f32 to vector<256x128xf32>
    %24 = arith.maximumf %23, %22 : vector<256x128xf32>
    %25 = vector.broadcast %cst_20 : f32 to vector<256x128xf32>
    %26 = arith.minimumf %25, %24 : vector<256x128xf32>
    %27 = arith.truncf %26 : vector<256x128xf32> to vector<256x128xbf16>
    %c0_21 = arith.constant 0 : index
    %c0_22 = arith.constant 0 : index
    %c0_23 = arith.constant 0 : index
    %28 = vector.load %arg7[%c0_21, %c0_22, %c0_23] : memref<1x256x128xbf16, #tpu.memory_space<vmem>>, vector<1x256x128xbf16>
    %29 = vector.shape_cast %28 : vector<1x256x128xbf16> to vector<256x128xbf16>
    %30 = vector.shape_cast %27 : vector<256x128xbf16> to vector<1x256x128xbf16>
    tpu.vector_store %arg7[%c0_21, %c0_22, %c0_23], %30 {strides = array<i32>} : memref<1x256x128xbf16, #tpu.memory_space<vmem>>, vector<1x256x128xbf16>,
    return
  }
  func.func @transform_0(%arg0: i32, %arg1: i32, %arg2: i32) -> (i32, i32, i32) {
    %c0_i32 = arith.constant 0 : i32
    %c0_i32_0 = arith.constant 0 : i32
    %c0_i32_1 = arith.constant 0 : i32
    return %arg0, %c0_i32, %c0_i32_0 : i32, i32, i32
  }
  func.func @transform_1(%arg0: i32, %arg1: i32, %arg2: i32) -> (i32, i32, i32) {
    %c0_i32 = arith.constant 0 : i32
    %c0_i32_0 = arith.constant 0 : i32
    %c0_i32_1 = arith.constant 0 : i32
    return %c0_i32, %c0_i32_0, %arg1 : i32, i32, i32
  }
  func.func @transform_2(%arg0: i32, %arg1: i32, %arg2: i32) -> (i32, i32) {
    %c0_i32 = arith.constant 0 : i32
    %c0_i32_0 = arith.constant 0 : i32
    return %c0_i32, %arg1 : i32, i32
  }
  func.func @transform_3(%arg0: i32, %arg1: i32, %arg2: i32) -> (i32, i32) {
    %c0_i32 = arith.constant 0 : i32
    %c0_i32_0 = arith.constant 0 : i32
    return %c0_i32, %arg1 : i32, i32
  }
  func.func @transform_4(%arg0: i32, %arg1: i32, %arg2: i32) -> (i32, i32, i32) {
    %c0_i32 = arith.constant 0 : i32
    return %arg0, %arg2, %arg1 : i32, i32, i32
  }
}

</mosaic_0001>

<bundles_post_ra>
// kernel: tpu_custom_call.1
= control target key start
LH: loop header
LB: loop body
LE: loop exit
PB: predicated region body
PF: predicated region fallthrough
CT: control target
= control target key end

     0   :  { %9 = vsyncpa [#allocation3], 0  ;;  %s2602_s0 = inlined_call_operand.vmem [shape: bf16[2,288,12], index: 0, kind: input, shape index: {}]   ;;  %s2603_s1 = inlined_call_operand.vmem [shape: bf16[3,12,128], index: 1, kind: input, shape index: {}]   ;;  %s2604_s2 = inlined_call_operand.vmem [shape: f32[1,128], index: 2, kind: input, shape index: {}]   ;;  %s2605_s3 = inlined_call_operand.vmem [shape: f32[1,128], index: 3, kind: input, shape index: {}]   ;;  %s2606_s4 = inlined_call_operand.hbm [shape: bf16[2,256,128], index: 4, kind: output, shape index: {}]  }
   0x1   :  { %11 = vsyncpa [#allocation3 + $0x1], 0  ;;  %s2270_s15 = smov 0   ;;  %s2272_s16 = smov 0  }
   0x2   :  { %s2274_s17 = smov 0   ;;  %s2276_s18 = smov 0  }
   0x3   :  { %s2278_s19 = smov 0   ;;  %s2280_s20 = smov 0  }
   0x4 LB: > { %s1580_s21 = sadd.s32 4294967295, %s2240_s20   ;;  %s1581_s22 = sadd.s32 4294967294, %s2240_s20   ;;  %s2240_s20 = sphi %s2280_s20, %s17_s20   ;;  %s2236_s19 = sphi %s2278_s19, %s2613_s19   ;;  %s2232_s18 = sphi %s2276_s18, %s2612_s18   ;;  %s2228_s17 = sphi %s2274_s17, %s2611_s17   ;;  %s2224_s16 = sphi %s2272_s16, %s2610_s16   ;;  %s2220_s15 = sphi %s2270_s15, %s2609_s15  }
   0x5   : > { %s36_s23 = sadd.s32 1, %s2236_s19  ;;  %s151_s24 = sadd.s32 1, %s2228_s17 }
   0x6   : > { %p38_p0 = scmp.ge.s32.totalorder %s36_s23, 2  ;;  %p161_p1 = scmp.ne.s32.totalorder %s2228_s17, %s2224_s16 }
   0x7   : > { %p162_p2 = scmp.eq.s32.totalorder %s1580_s21, 1  ;;  %p167_p3 = scmp.ne.s32.totalorder %s2224_s16, %s2220_s15 }
   0x8   : > { %s2615_s23 = smov (%p38_p0, %s36_s23), 0  ;;  %p168_p5 = scmp.eq.s32.totalorder %s1581_s22, 1 }
   0x9   : > { %p2310_p4 = por %p162_p2, %p161_p1  ;;  %s144_s26 = ssub.s32 %s2236_s19, %s2615_s23 }
   0xa   : > { %p1587_p6 = scmp.ge.s32.totalorder %s2240_s20, 1  ;;  %p149_p7 = scmp.eq.s32.totalorder %s144_s26, 0 }
   0xb   : > { %p2317_p8 = por %p168_p5, %p167_p3  ;;  %p213_p9 = scmp.lt.s32.totalorder %s2240_s20, 3 }
   0xc   : > { %s2323_s28 = scalar_select %p149_p7, %s2228_s17, %s151_s24  }
   0xd   : > { %p214_p10 = pnand %p1587_p6, %p213_p9 }
   0xe   : > { %v2126_v0 = vld [vmem:[%s2603_s1 + $0x8] sm:$0x3f] (!%p214_p10)   ;;  %vm439_vm0 = vcmask (!%p214_p10), 1045504   ;;  %p249_p11 = scmp.lt.s32.totalorder (!%p214_p10), %s2232_s18, 1  ;;  %v2127_v1 = vld [vmem:[%s2603_s1] sm:$0x3f] (!%p214_p10)  }
   0xf   : > { %217 = sbr.rel (%p214_p10) target bundleno = 359 (0x167), region = 36  ;;  %2064 = vmatprep.subr.msk.bf16.mxu1 (!%p214_p10), %vm439_vm0, %v2126_v0  ;;  %v441_v2 = vsel (!%p214_p10), %vm439_vm0, %v2126_v0, 0  ;;  %v2130_v3 = vld [vmem:[%s2603_s1 + $0x10] sm:$0x3f] (!%p214_p10)   ;;  %2065 = vmatprep.subr.msk.bf16.mxu0 (!%p214_p10), %vm439_vm0, %v2127_v1  ;;  %v618_v4 = vsel (!%p214_p10), %vm439_vm0, %v2127_v1, 0  ;;  %vm390_vm1 = vcmask (!%p214_p10), 97280  }
  0x10   : > { %1897 = vmatpush3.bf16.msra.mxu1 (!%p214_p10), %v441_v2  ;;  %1931 = vmatpush3.bf16.msra.mxu0 (!%p214_p10), %v618_v4  ;;  %v950_v8 = vsel (!%p214_p10), %vm439_vm0, %v2130_v3, 0  ;;  %v2446_v56 = vld [vmem:[%s2604_s2] ss:$0 sm:$0xff] (!%p214_p10)  ;;  %s246_s26 = sand.u32 (!%p214_p10), 1, %s2224_s16   ;;  %s1749_s5 = sshll.u32 (!%p214_p10), %s2232_s18, 11 }
  0x11   : > { %2066 = vmatprep.subr.msk.bf16.mxu1 (!%p214_p10), %vm439_vm0, %v2127_v1  ;;  %2067 = vmatprep.subr.msk.bf16.mxu0 (!%p214_p10), %vm439_vm0, %v2130_v3  ;;  %v2451_v59 = vld [vmem:[%s2605_s3] ss:$0 sm:$0xff] (!%p214_p10)  ;;  %s1588_s29 = sshll.u32 (!%p214_p10), %s246_s26, 7  ;;  %s2548_s9 = scalar_lea.hbm (!%p214_p10), %s2606_s4, %s1749_s5 }
  0x12   : > { %s2470_s30 = scalar_lea.vmem (!%p214_p10), [#allocation2], %s1588_s29  ;;  %s2242_s11 = smov (!%p214_p10), [#allocation2]  }
  0x13   : > { %s1464_s6 = sshll.u32 (!%p214_p10), %s2470_s30, 4  ;;  %s2166_s12 = sshll.u32 (!%p214_p10), %s2242_s11, 4  ;;  %s2550_s6 = int_to_ptr.vmem [resolvable:$true] %s1464_s6  ;;  %s2167_s12 = int_to_ptr.vmem [resolvable:$false] %s2166_s12 }
  0x14   : > { %p2169_p1 = scmp.lt.s32.totalorder (!%p214_p10), %s2550_s6, %s2167_s12 }
  0x16   : > { %s250_s7 = scalar_select %p249_p11, %s2232_s18, 1 }
  0x17   : > { %s2556_s18 = scalar_lea.sflag [#allocation3], %s246_s26 }
  0x18   : > { %s2068_s10 = smul.u32 144, %s250_s7 }
  0x1a   : > { %s2345_s13 = scalar_lea.vmem %s2602_s0, %s2068_s10  ;;  %s2162_s10 = scalar_lea.vmem %s2550_s6, 2048 }
  0x1b   : > { %v2128_v5 = vld [vmem:[%s2345_s13 + $0x8] sm:$0xff]   ;;  %v2129_v6 = vld [vmem:[%s2345_s13] sm:$0xff]   ;;  %v2131_v7 = vld [vmem:[%s2345_s13 + $0x10] sm:$0xff]   ;;  %p2163_p12 = scmp.ne.s32.totalorder %s2550_s6, %s2162_s10 }
  0x1c   : > { %1898 = vmatprep.mubr.msk.bf16.mxu1 %vm390_vm1, %v2128_v5  ;;  %1932 = vmatprep.mubr.msk.bf16.mxu0 %vm390_vm1, %v2129_v6  ;;  %v2132_v9 = vld [vmem:[%s2345_s13 + $0x18] sm:$0xff]   ;;  %v2133_v10 = vld [vmem:[%s2345_s13 + $0x20] sm:$0xff]   ;;  %v2134_v11 = vld [vmem:[%s2345_s13 + $0x28] sm:$0xff]  }
  0x1d   : > { %1899 = vmatmul.mubr.msk.bf16.vlgmr.msra.gmra.mrb[0].mxu1 %vm390_vm1, %v2131_v7  ;;  %1933 = vmatmul.mubr.msk.bf16.vlgmr.msra.gmra.mrb[0].mxu0 %vm390_vm1, %v2128_v5  ;;  %v2135_v12 = vld [vmem:[%s2345_s13 + $0x30] sm:$0xff]   ;;  %v2136_v13 = vld [vmem:[%s2345_s13 + $0x38] sm:$0xff]   ;;  %v2137_v14 = vld [vmem:[%s2345_s13 + $0x40] sm:$0xff]   ;;  %p2164_p13 = pnand %p2163_p12, %p2310_p4 }
  0x1e   : > { %1999 = vmatpush3.bf16.msra.mxu1 %v618_v4  ;;  %1965 = vmatpush3.bf16.msra.mxu0 %v950_v8  ;;  %v2138_v15 = vld [vmem:[%s2345_s13 + $0x48] sm:$0xff]   ;;  %v2139_v16 = vld [vmem:[%s2345_s13 + $0x10] sm:$0xff]   ;;  %v2141_v18 = vld [vmem:[%s2345_s13 + $0x18] sm:$0xff]  }
  0x1f   : > { %1902 = vmatprep.mubr.msk.bf16.mxu1 %vm390_vm1, %v2132_v9  ;;  %1936 = vmatprep.mubr.msk.bf16.mxu0 %vm390_vm1, %v2131_v7  ;;  %v2140_v17 = vld [vmem:[%s2345_s13 + $0x50] sm:$0xff]   ;;  %v2142_v19 = vld [vmem:[%s2345_s13 + $0x58] sm:$0xff]   ;;  %v2143_v20 = vld [vmem:[%s2345_s13 + $0x20] sm:$0xff]   ;;  %p2165_p0 = pneg %p2164_p13 }
  0x20   : > { %v2144_v21 = vld [vmem:[%s2345_s13 + $0x60] sm:$0xff]   ;;  %v2145_v22 = vld [vmem:[%s2345_s13 + $0x28] sm:$0xff]   ;;  %v2147_v24 = vld [vmem:[%s2345_s13 + $0x30] sm:$0xff]  }
  0x21   : > { %v2146_v23 = vld [vmem:[%s2345_s13 + $0x68] sm:$0xff]   ;;  %v2148_v25 = vld [vmem:[%s2345_s13 + $0x70] sm:$0xff]   ;;  %v2149_v26 = vld [vmem:[%s2345_s13 + $0x38] sm:$0xff]  }
  0x22   : > { %v2150_v27 = vld [vmem:[%s2345_s13 + $0x78] sm:$0xff]   ;;  %v2151_v28 = vld [vmem:[%s2345_s13 + $0x40] sm:$0xff]   ;;  %v2153_v30 = vld [vmem:[%s2345_s13 + $0x48] sm:$0xff]  }
  0x23   : > { %v2152_v29 = vld [vmem:[%s2345_s13 + $0x80] sm:$0xff]   ;;  %v2154_v31 = vld [vmem:[%s2345_s13 + $0x50] sm:$0xff]   ;;  %v2155_v32 = vld [vmem:[%s2345_s13 + $0x58] sm:$0xff]  }
  0x24   : > { %v2156_v33 = vld [vmem:[%s2345_s13 + $0x60] sm:$0xff]   ;;  %v2157_v34 = vld [vmem:[%s2345_s13 + $0x68] sm:$0xff]   ;;  %v2158_v35 = vld [vmem:[%s2345_s13 + $0x70] sm:$0xff]  }
  0x25   : > { %1903 = vmatmul.mubr.msk.bf16.gmra.mrb[4].mxu1 %vm390_vm1, %v2133_v10  ;;  %1937 = vmatmul.mubr.msk.bf16.gmra.mrb[4].mxu0 %vm390_vm1, %v2132_v9  ;;  %v2159_v36 = vld [vmem:[%s2345_s13 + $0x78] sm:$0xff]   ;;  %v2160_v37 = vld [vmem:[%s2345_s13 + $0x80] sm:$0xff]   ;;  %v2161_v38 = vld [vmem:[%s2345_s13 + $0x88] sm:$0xff]   ;;  %s2168_s13 = scalar_lea.vmem %s2167_s12, 4096 }
  0x26   : > { %1906 = vmatprep.mubr.msk.bf16.mxu1 %vm390_vm1, %v2134_v11  ;;  %1940 = vmatprep.mubr.msk.bf16.mxu0 %vm390_vm1, %v2133_v10  ;;  %p2170_p2 = scmp.lt.s32.totalorder %s2168_s13, %s2162_s10 }
  0x28   : > { %p2171_p3 = por %p2170_p2, %p2169_p1 }
  0x2a   : > { %p2172_p5 = pnand %p2171_p3, %p2165_p0 }
  0x2d   : > { %1907 = vmatmul.mubr.msk.bf16.gmra.mrb[8].mxu1 %vm390_vm1, %v2135_v12  ;;  %1941 = vmatmul.mubr.msk.bf16.gmra.mrb[8].mxu0 %vm390_vm1, %v2134_v11 }
  0x2e   : > { %1910 = vmatprep.mubr.msk.bf16.mxu1 %vm390_vm1, %v2136_v13  ;;  %1944 = vmatprep.mubr.msk.bf16.mxu0 %vm390_vm1, %v2135_v12 }
  0x35   : > { %1911 = vmatmul.mubr.msk.bf16.gmra.mrb[12].mxu1 %vm390_vm1, %v2137_v14  ;;  %1945 = vmatmul.mubr.msk.bf16.gmra.mrb[12].mxu0 %vm390_vm1, %v2136_v13 }
  0x36   : > { %1914 = vmatprep.mubr.msk.bf16.mxu1 %vm390_vm1, %v2138_v15  ;;  %1966 = vmatprep.mubr.msk.bf16.mxu0 %vm390_vm1, %v2139_v16 }
  0x3d   : > { %1915 = vmatmul.mubr.msk.bf16.gmra.mrb[16].mxu1 %vm390_vm1, %v2140_v17  ;;  %1967 = vmatmul.mubr.msk.bf16.vlgmr.msra.gmra.mrb[0].mxu0 %vm390_vm1, %v2141_v18 }
  0x3e   : > { %1918 = vmatprep.mubr.msk.bf16.mxu1 %vm390_vm1, %v2142_v19  ;;  %1970 = vmatprep.mubr.msk.bf16.mxu0 %vm390_vm1, %v2143_v20 }
  0x45   : > { %1919 = vmatmul.mubr.msk.bf16.gmra.mrb[20].mxu1 %vm390_vm1, %v2144_v21  ;;  %1971 = vmatmul.mubr.msk.bf16.gmra.mrb[4].mxu0 %vm390_vm1, %v2145_v22 }
  0x46   : > { %1922 = vmatprep.mubr.msk.bf16.mxu1 %vm390_vm1, %v2146_v23  ;;  %1974 = vmatprep.mubr.msk.bf16.mxu0 %vm390_vm1, %v2147_v24 }
  0x4d   : > { %1923 = vmatmul.mubr.msk.bf16.gmra.mrb[24].mxu1 %vm390_vm1, %v2148_v25  ;;  %1975 = vmatmul.mubr.msk.bf16.gmra.mrb[8].mxu0 %vm390_vm1, %v2149_v26 }
  0x4e   : > { %1926 = vmatprep.mubr.msk.bf16.mxu1 %vm390_vm1, %v2150_v27  ;;  %1978 = vmatprep.mubr.msk.bf16.mxu0 %vm390_vm1, %v2151_v28 }
  0x55   : > { %1927 = vmatmul.mubr.msk.bf16.gmra.mrb[28].mxu1 %vm390_vm1, %v2152_v29  ;;  %1979 = vmatmul.mubr.msk.bf16.gmra.mrb[12].mxu0 %vm390_vm1, %v2153_v30 }
  0x56   : > { %1948 = vmatprep.mubr.msk.bf16.mxu1 %vm390_vm1, %v2137_v14  ;;  %1982 = vmatprep.mubr.msk.bf16.mxu0 %vm390_vm1, %v2154_v31 }
  0x5d   : > { %1949 = vmatmul.mubr.msk.bf16.vlgmr.msra.gmra.mrb[16].mxu1 %vm390_vm1, %v2138_v15  ;;  %1983 = vmatmul.mubr.msk.bf16.gmra.mrb[16].mxu0 %vm390_vm1, %v2155_v32 }
  0x5e   : > { %1952 = vmatprep.mubr.msk.bf16.mxu1 %vm390_vm1, %v2140_v17  ;;  %1986 = vmatprep.mubr.msk.bf16.mxu0 %vm390_vm1, %v2156_v33 }
  0x65   : > { %1953 = vmatmul.mubr.msk.bf16.gmra.mrb[20].mxu1 %vm390_vm1, %v2142_v19  ;;  %1987 = vmatmul.mubr.msk.bf16.gmra.mrb[20].mxu0 %vm390_vm1, %v2157_v34 }
  0x66   : > { %1956 = vmatprep.mubr.msk.bf16.mxu1 %vm390_vm1, %v2144_v21  ;;  %1990 = vmatprep.mubr.msk.bf16.mxu0 %vm390_vm1, %v2158_v35 }
  0x6d   : > { %1957 = vmatmul.mubr.msk.bf16.gmra.mrb[24].mxu1 %vm390_vm1, %v2146_v23  ;;  %1991 = vmatmul.mubr.msk.bf16.gmra.mrb[24].mxu0 %vm390_vm1, %v2159_v36 }
  0x6e   : > { %1960 = vmatprep.mubr.msk.bf16.mxu1 %vm390_vm1, %v2148_v25  ;;  %1994 = vmatprep.mubr.msk.bf16.mxu0 %vm390_vm1, %v2160_v37 }
  0x75   : > { %1961 = vmatmul.mubr.msk.bf16.gmra.mrb[28].mxu1 %vm390_vm1, %v2150_v27  ;;  %1995 = vmatmul.mubr.msk.bf16.gmra.mrb[28].mxu0 %vm390_vm1, %v2161_v38 }
  0xf0   : > { %v1900_v39 = vpop.f32.mrb[0].mxu1 }
  0xf1   : > { %v477_v40 = vpop.f32.mrb[1].mxu1 }
  0xf2   : > { %v1901_v41 = vpop.f32.mrb[2].mxu1 }
  0xf3   : > { %v480_v42 = vpop.f32.mrb[3].mxu1 }
  0xf8   : > { %v1904_v43 = vpop.f32.mrb[4].mxu1 }
  0xf9   : > { %v493_v44 = vpop.f32.mrb[5].mxu1 }
  0xfa   : > { %v1905_v45 = vpop.f32.mrb[6].mxu1 }
  0xfb   : > { %v496_v46 = vpop.f32.mrb[7].mxu1 }
 0x100   : > { %v1908_v47 = vpop.f32.mrb[8].mxu1 }
 0x101   : > { %v2429_v48 = vpop.f32.mrb[9].mxu1 }
 0x102   : > { %v2431_v49 = vpop.f32.mrb[10].mxu1 }
 0x103   : > { %v2433_v50 = vpop.f32.mrb[11].mxu1 }
 0x108   : > { %v2435_v51 = vpop.f32.mrb[12].mxu1 }
 0x109   : > { %v2437_v52 = vpop.f32.mrb[13].mxu1 }
 0x10a   : > { %v2439_v53 = vpop.f32.mrb[14].mxu1 }
 0x10b   : > { %v2441_v54 = vpop.f32.mrb[15].mxu1 }
 0x110   : > { %v1968_v55 = vpop.f32.mrb[0].mxu0 }
 0x111   : > { %v2000_v57 = vadd.f32 %v1968_v55, %v1900_v39  ;;  %v986_v58 = vpop.f32.mrb[1].mxu0 }
 0x112   : > { %v2001_v60 = vadd.f32 %v986_v58, %v477_v40  ;;  %v1969_v61 = vpop.f32.mrb[2].mxu0 }
 0x113   : > { %v1154_v62 = vmul.f32 %v2000_v57, %v2446_v56  ;;  %v2002_v63 = vadd.f32 %v1969_v61, %v1901_v41  ;;  %v989_v0 = vpop.f32.mrb[3].mxu0 }
 0x114   : > { %v1152_v1 = vmul.f32 %v2001_v60, %v2446_v56  ;;  %v2003_v2 = vadd.f32 %v989_v0, %v480_v42 }
 0x115   : > { %v1193_v3 = vadd.f32 %v2451_v59, %v1154_v62  ;;  %v1155_v4 = vmul.f32 %v2002_v63, %v2446_v56 }
 0x116   : > { %v1191_v5 = vadd.f32 %v2451_v59, %v1152_v1  ;;  %v1153_v6 = vmul.f32 %v2003_v2, %v2446_v56 }
 0x117   : > { %v1225_v7 = vmax.f32 %v1193_v3, 0.0  ;;  %v1194_v8 = vadd.f32 %v2451_v59, %v1155_v4 }
 0x118   : > { %v1223_v9 = vmax.f32 %v1191_v5, 0.0  ;;  %v1192_v10 = vadd.f32 %v2451_v59, %v1153_v6  ;;  %v1972_v11 = vpop.f32.mrb[4].mxu0 }
 0x119   : > { %v1226_v12 = vmax.f32 %v1194_v8, 0.0  ;;  %v2004_v13 = vadd.f32 %v1972_v11, %v1904_v43  ;;  %v1002_v14 = vpop.f32.mrb[5].mxu0  ;;  %v1257_v18 = vmin.f32 %v1225_v7, 6.0 }
 0x11a   : > { %v1224_v15 = vmax.f32 %v1192_v10, 0.0  ;;  %v2005_v16 = vadd.f32 %v1002_v14, %v493_v44  ;;  %v1973_v17 = vpop.f32.mrb[6].mxu0  ;;  %v1255_v23 = vmin.f32 %v1223_v9, 6.0 }
 0x11b   : > { %v1258_v19 = vmin.f32 %v1226_v12, 6.0  ;;  %v1158_v20 = vmul.f32 %v2004_v13, %v2446_v56  ;;  %v2006_v21 = vadd.f32 %v1973_v17, %v1905_v45  ;;  %v1005_v22 = vpop.f32.mrb[7].mxu0 }
 0x11c   : > { %v1256_v24 = vmin.f32 %v1224_v15, 6.0  ;;  %v1156_v25 = vmul.f32 %v2005_v16, %v2446_v56  ;;  %v2007_v26 = vadd.f32 %v1005_v22, %v496_v46 }
 0x11d   : > { %v1758_v27 = vpack.c.bf16 %v1258_v19, %v1257_v18  ;;  %v1197_v28 = vadd.f32 %v2451_v59, %v1158_v20  ;;  %v1159_v29 = vmul.f32 %v2006_v21, %v2446_v56 }
 0x11e   : > { %v1753_v30 = vpack.c.bf16 %v1256_v24, %v1255_v23  ;;  %v1195_v31 = vadd.f32 %v2451_v59, %v1156_v25  ;;  %v1157_v32 = vmul.f32 %v2007_v26, %v2446_v56 }
 0x11f   : > { %1830 = vst [vmem:[%s2470_s30 + $0x8] sm:$0xff] %v1758_v27   ;;  %v1229_v33 = vmax.f32 %v1197_v28, 0.0  ;;  %v1198_v34 = vadd.f32 %v2451_v59, %v1159_v29 }
 0x120   : > { %1754 = vst [vmem:[%s2470_s30] sm:$0xff] %v1753_v30   ;;  %v1227_v35 = vmax.f32 %v1195_v31, 0.0  ;;  %v1196_v36 = vadd.f32 %v2451_v59, %v1157_v32  ;;  %v1976_v37 = vpop.f32.mrb[8].mxu0 }
 0x121   : > { %v1230_v38 = vmax.f32 %v1198_v34, 0.0  ;;  %v2008_v39 = vadd.f32 %v1976_v37, %v1908_v47  ;;  %v1018_v40 = vpop.f32.mrb[9].mxu0  ;;  %v1261_v44 = vmin.f32 %v1229_v33, 6.0 }
 0x122   : > { %v1228_v41 = vmax.f32 %v1196_v36, 0.0  ;;  %v2009_v42 = vadd.f32 %v1018_v40, %v2429_v48  ;;  %v1977_v43 = vpop.f32.mrb[10].mxu0  ;;  %v1259_v58 = vmin.f32 %v1227_v35, 6.0 }
 0x123   : > { %v1262_v45 = vmin.f32 %v1230_v38, 6.0  ;;  %v1162_v46 = vmul.f32 %v2008_v39, %v2446_v56  ;;  %v2010_v55 = vadd.f32 %v1977_v43, %v2431_v49  ;;  %v1021_v57 = vpop.f32.mrb[11].mxu0 }
 0x124   : > { %v1260_v60 = vmin.f32 %v1228_v41, 6.0  ;;  %v1160_v61 = vmul.f32 %v2009_v42, %v2446_v56  ;;  %v2011_v47 = vadd.f32 %v1021_v57, %v2433_v50 }
 0x125   : > { %v1768_v62 = vpack.c.bf16 %v1262_v45, %v1261_v44  ;;  %v1201_v63 = vadd.f32 %v2451_v59, %v1162_v46  ;;  %v1163_v48 = vmul.f32 %v2010_v55, %v2446_v56 }
 0x126   : > { %v1763_v0 = vpack.c.bf16 %v1260_v60, %v1259_v58  ;;  %v1199_v1 = vadd.f32 %v2451_v59, %v1160_v61  ;;  %v1161_v2 = vmul.f32 %v2011_v47, %v2446_v56 }
 0x127   : > { %1832 = vst [vmem:[%s2470_s30 + $0x18] sm:$0xff] %v1768_v62   ;;  %v1233_v3 = vmax.f32 %v1201_v63, 0.0  ;;  %v1202_v49 = vadd.f32 %v2451_v59, %v1163_v48 }
 0x128   : > { %1831 = vst [vmem:[%s2470_s30 + $0x10] sm:$0xff] %v1763_v0   ;;  %v1231_v4 = vmax.f32 %v1199_v1, 0.0  ;;  %v1200_v5 = vadd.f32 %v2451_v59, %v1161_v2  ;;  %v1980_v6 = vpop.f32.mrb[12].mxu0 }
 0x129   : > { %v1234_v50 = vmax.f32 %v1202_v49, 0.0  ;;  %v2012_v7 = vadd.f32 %v1980_v6, %v2435_v51  ;;  %v1034_v8 = vpop.f32.mrb[13].mxu0  ;;  %v1265_v12 = vmin.f32 %v1233_v3, 6.0 }
 0x12a   : > { %v1232_v9 = vmax.f32 %v1200_v5, 0.0  ;;  %v2013_v10 = vadd.f32 %v1034_v8, %v2437_v52  ;;  %v1981_v11 = vpop.f32.mrb[14].mxu0  ;;  %v1263_v17 = vmin.f32 %v1231_v4, 6.0 }
 0x12b   : > { %v1266_v13 = vmin.f32 %v1234_v50, 6.0  ;;  %v1166_v14 = vmul.f32 %v2012_v7, %v2446_v56  ;;  %v2014_v15 = vadd.f32 %v1981_v11, %v2439_v53  ;;  %v1037_v16 = vpop.f32.mrb[15].mxu0 }
 0x12c   : > { %v1264_v18 = vmin.f32 %v1232_v9, 6.0  ;;  %v1164_v19 = vmul.f32 %v2013_v10, %v2446_v56  ;;  %v2015_v51 = vadd.f32 %v1037_v16, %v2441_v54 }
 0x12d   : > { %v1778_v20 = vpack.c.bf16 %v1266_v13, %v1265_v12  ;;  %v1205_v21 = vadd.f32 %v2451_v59, %v1166_v14  ;;  %v1167_v52 = vmul.f32 %v2014_v15, %v2446_v56 }
 0x12e   : > { %v1773_v22 = vpack.c.bf16 %v1264_v18, %v1263_v17  ;;  %v1203_v23 = vadd.f32 %v2451_v59, %v1164_v19  ;;  %v1165_v24 = vmul.f32 %v2015_v51, %v2446_v56 }
 0x12f   : > { %1834 = vst [vmem:[%s2470_s30 + $0x28] sm:$0xff] %v1778_v20   ;;  %v1237_v25 = vmax.f32 %v1205_v21, 0.0  ;;  %v1206_v53 = vadd.f32 %v2451_v59, %v1167_v52 }
 0x130   : > { %1833 = vst [vmem:[%s2470_s30 + $0x20] sm:$0xff] %v1773_v22   ;;  %v1235_v26 = vmax.f32 %v1203_v23, 0.0  ;;  %v1204_v27 = vadd.f32 %v2451_v59, %v1165_v24  ;;  %v1950_v28 = vpop.f32.mrb[16].mxu1  ;;  %v1984_v54 = vpop.f32.mrb[16].mxu0 }
 0x131   : > { %v1238_v29 = vmax.f32 %v1206_v53, 0.0  ;;  %v2016_v30 = vadd.f32 %v1984_v54, %v1950_v28  ;;  %v718_v31 = vpop.f32.mrb[17].mxu1  ;;  %v1050_v32 = vpop.f32.mrb[17].mxu0  ;;  %v1269_v37 = vmin.f32 %v1237_v25, 6.0 }
 0x132   : > { %v1236_v33 = vmax.f32 %v1204_v27, 0.0  ;;  %v2017_v34 = vadd.f32 %v1050_v32, %v718_v31  ;;  %v1951_v35 = vpop.f32.mrb[18].mxu1  ;;  %v1985_v36 = vpop.f32.mrb[18].mxu0  ;;  %v1267_v43 = vmin.f32 %v1235_v26, 6.0 }
 0x133   : > { %v1270_v38 = vmin.f32 %v1238_v29, 6.0  ;;  %v1170_v39 = vmul.f32 %v2016_v30, %v2446_v56  ;;  %v2018_v40 = vadd.f32 %v1985_v36, %v1951_v35  ;;  %v721_v41 = vpop.f32.mrb[19].mxu1  ;;  %v1053_v42 = vpop.f32.mrb[19].mxu0 }
 0x134   : > { %v1268_v44 = vmin.f32 %v1236_v33, 6.0  ;;  %v1168_v45 = vmul.f32 %v2017_v34, %v2446_v56  ;;  %v2019_v46 = vadd.f32 %v1053_v42, %v721_v41 }
 0x135   : > { %v1788_v55 = vpack.c.bf16 %v1270_v38, %v1269_v37  ;;  %v1209_v57 = vadd.f32 %v2451_v59, %v1170_v39  ;;  %v1171_v58 = vmul.f32 %v2018_v40, %v2446_v56 }
 0x136   : > { %v1783_v60 = vpack.c.bf16 %v1268_v44, %v1267_v43  ;;  %v1207_v61 = vadd.f32 %v2451_v59, %v1168_v45  ;;  %v1169_v47 = vmul.f32 %v2019_v46, %v2446_v56 }
 0x137   : > { %1836 = vst [vmem:[%s2470_s30 + $0x38] sm:$0xff] %v1788_v55   ;;  %v1241_v62 = vmax.f32 %v1209_v57, 0.0  ;;  %v1210_v63 = vadd.f32 %v2451_v59, %v1171_v58 }
 0x138   : > { %1835 = vst [vmem:[%s2470_s30 + $0x30] sm:$0xff] %v1783_v60   ;;  %v1239_v48 = vmax.f32 %v1207_v61, 0.0  ;;  %v1208_v0 = vadd.f32 %v2451_v59, %v1169_v47  ;;  %v1954_v1 = vpop.f32.mrb[20].mxu1  ;;  %v1988_v2 = vpop.f32.mrb[20].mxu0 }
 0x139   : > { %v1242_v3 = vmax.f32 %v1210_v63, 0.0  ;;  %v2020_v49 = vadd.f32 %v1988_v2, %v1954_v1  ;;  %v734_v4 = vpop.f32.mrb[21].mxu1  ;;  %v1066_v5 = vpop.f32.mrb[21].mxu0  ;;  %v1273_v9 = vmin.f32 %v1241_v62, 6.0 }
 0x13a   : > { %v1240_v6 = vmax.f32 %v1208_v0, 0.0  ;;  %v2021_v50 = vadd.f32 %v1066_v5, %v734_v4  ;;  %v1955_v7 = vpop.f32.mrb[22].mxu1  ;;  %v1989_v8 = vpop.f32.mrb[22].mxu0  ;;  %v1271_v15 = vmin.f32 %v1239_v48, 6.0 }
 0x13b   : > { %v1274_v10 = vmin.f32 %v1242_v3, 6.0  ;;  %v1174_v11 = vmul.f32 %v2020_v49, %v2446_v56  ;;  %v2022_v12 = vadd.f32 %v1989_v8, %v1955_v7  ;;  %v737_v13 = vpop.f32.mrb[23].mxu1  ;;  %v1069_v14 = vpop.f32.mrb[23].mxu0 }
 0x13c   : > { %v1272_v16 = vmin.f32 %v1240_v6, 6.0  ;;  %v1172_v17 = vmul.f32 %v2021_v50, %v2446_v56  ;;  %v2023_v18 = vadd.f32 %v1069_v14, %v737_v13 }
 0x13d   : > { %v1798_v19 = vpack.c.bf16 %v1274_v10, %v1273_v9  ;;  %v1213_v51 = vadd.f32 %v2451_v59, %v1174_v11  ;;  %v1175_v20 = vmul.f32 %v2022_v12, %v2446_v56 }
 0x13e   : > { %v1793_v21 = vpack.c.bf16 %v1272_v16, %v1271_v15  ;;  %v1211_v52 = vadd.f32 %v2451_v59, %v1172_v17  ;;  %v1173_v22 = vmul.f32 %v2023_v18, %v2446_v56 }
 0x13f   : > { %1838 = vst [vmem:[%s2470_s30 + $0x48] sm:$0xff] %v1798_v19   ;;  %v1245_v23 = vmax.f32 %v1213_v51, 0.0  ;;  %v1214_v24 = vadd.f32 %v2451_v59, %v1175_v20 }
 0x140   : > { %1837 = vst [vmem:[%s2470_s30 + $0x40] sm:$0xff] %v1793_v21   ;;  %v1243_v25 = vmax.f32 %v1211_v52, 0.0  ;;  %v1212_v53 = vadd.f32 %v2451_v59, %v1173_v22  ;;  %v1958_v26 = vpop.f32.mrb[24].mxu1  ;;  %v1992_v27 = vpop.f32.mrb[24].mxu0 }
 0x141   : > { %v1246_v28 = vmax.f32 %v1214_v24, 0.0  ;;  %v2024_v54 = vadd.f32 %v1992_v27, %v1958_v26  ;;  %v750_v29 = vpop.f32.mrb[25].mxu1  ;;  %v1082_v30 = vpop.f32.mrb[25].mxu0  ;;  %v1277_v35 = vmin.f32 %v1245_v23, 6.0 }
 0x142   : > { %v1244_v31 = vmax.f32 %v1212_v53, 0.0  ;;  %v2025_v32 = vadd.f32 %v1082_v30, %v750_v29  ;;  %v1959_v33 = vpop.f32.mrb[26].mxu1  ;;  %v1993_v34 = vpop.f32.mrb[26].mxu0  ;;  %v1275_v41 = vmin.f32 %v1243_v25, 6.0 }
 0x143   : > { %v1278_v36 = vmin.f32 %v1246_v28, 6.0  ;;  %v1178_v37 = vmul.f32 %v2024_v54, %v2446_v56  ;;  %v2026_v38 = vadd.f32 %v1993_v34, %v1959_v33  ;;  %v753_v39 = vpop.f32.mrb[27].mxu1  ;;  %v1085_v40 = vpop.f32.mrb[27].mxu0 }
 0x144   : > { %v1276_v42 = vmin.f32 %v1244_v31, 6.0  ;;  %v1176_v43 = vmul.f32 %v2025_v32, %v2446_v56  ;;  %v2027_v44 = vadd.f32 %v1085_v40, %v753_v39 }
 0x145   : > { %v1808_v45 = vpack.c.bf16 %v1278_v36, %v1277_v35  ;;  %v1217_v46 = vadd.f32 %v2451_v59, %v1178_v37  ;;  %v1179_v55 = vmul.f32 %v2026_v38, %v2446_v56 }
 0x146   : > { %v1803_v57 = vpack.c.bf16 %v1276_v42, %v1275_v41  ;;  %v1215_v58 = vadd.f32 %v2451_v59, %v1176_v43  ;;  %v1177_v60 = vmul.f32 %v2027_v44, %v2446_v56 }
 0x147   : > { %1840 = vst [vmem:[%s2470_s30 + $0x58] sm:$0xff] %v1808_v45   ;;  %v1249_v61 = vmax.f32 %v1217_v46, 0.0  ;;  %v1218_v47 = vadd.f32 %v2451_v59, %v1179_v55 }
 0x148   : > { %1839 = vst [vmem:[%s2470_s30 + $0x50] sm:$0xff] %v1803_v57   ;;  %v1247_v62 = vmax.f32 %v1215_v58, 0.0  ;;  %v1216_v63 = vadd.f32 %v2451_v59, %v1177_v60  ;;  %v1962_v48 = vpop.f32.mrb[28].mxu1  ;;  %v1996_v0 = vpop.f32.mrb[28].mxu0 }
 0x149   : > { %v1250_v1 = vmax.f32 %v1218_v47, 0.0  ;;  %v2028_v2 = vadd.f32 %v1996_v0, %v1962_v48  ;;  %v766_v3 = vpop.f32.mrb[29].mxu1  ;;  %v1098_v49 = vpop.f32.mrb[29].mxu0  ;;  %v1281_v7 = vmin.f32 %v1249_v61, 6.0 }
 0x14a   : > { %v1248_v4 = vmax.f32 %v1216_v63, 0.0  ;;  %v2029_v5 = vadd.f32 %v1098_v49, %v766_v3  ;;  %v1963_v6 = vpop.f32.mrb[30].mxu1  ;;  %v1997_v50 = vpop.f32.mrb[30].mxu0  ;;  %v1279_v13 = vmin.f32 %v1247_v62, 6.0 }
 0x14b   : > { %v1282_v8 = vmin.f32 %v1250_v1, 6.0  ;;  %v1182_v9 = vmul.f32 %v2028_v2, %v2446_v56  ;;  %v2030_v10 = vadd.f32 %v1997_v50, %v1963_v6  ;;  %v769_v11 = vpop.f32.mrb[31].mxu1  ;;  %v1101_v12 = vpop.f32.mrb[31].mxu0 }
 0x14c   : > { %v1280_v14 = vmin.f32 %v1248_v4, 6.0  ;;  %v1180_v15 = vmul.f32 %v2029_v5, %v2446_v56  ;;  %v2031_v16 = vadd.f32 %v1101_v12, %v769_v11 }
 0x14d   : > { %v1818_v17 = vpack.c.bf16 %v1282_v8, %v1281_v7  ;;  %v1221_v18 = vadd.f32 %v2451_v59, %v1182_v9  ;;  %v1183_v19 = vmul.f32 %v2030_v10, %v2446_v56 }
 0x14e   : > { %v1813_v51 = vpack.c.bf16 %v1280_v14, %v1279_v13  ;;  %v1219_v20 = vadd.f32 %v2451_v59, %v1180_v15  ;;  %v1181_v21 = vmul.f32 %v2031_v16, %v2446_v56 }
 0x14f   : > { %1842 = vst [vmem:[%s2470_s30 + $0x68] sm:$0xff] %v1818_v17   ;;  %v1253_v52 = vmax.f32 %v1221_v18, 0.0  ;;  %v1222_v22 = vadd.f32 %v2451_v59, %v1183_v19 }
 0x150   : > { %1841 = vst [vmem:[%s2470_s30 + $0x60] sm:$0xff] %v1813_v51   ;;  %v1251_v23 = vmax.f32 %v1219_v20, 0.0  ;;  %v1220_v24 = vadd.f32 %v2451_v59, %v1181_v21 }
 0x151   : > { %v1254_v25 = vmax.f32 %v1222_v22, 0.0  ;;  %v1285_v26 = vmin.f32 %v1253_v52, 6.0 }
 0x152   : > { %v1252_v53 = vmax.f32 %v1220_v24, 0.0  ;;  %v1283_v28 = vmin.f32 %v1251_v23, 6.0 }
 0x153   : > { %v1286_v27 = vmin.f32 %v1254_v25, 6.0 }
 0x154   : > { %v1284_v56 = vmin.f32 %v1252_v53, 6.0 }
 0x155   : > { %v1828_v54 = vpack.c.bf16 %v1286_v27, %v1285_v26 }
 0x156   : > { %v1823_v59 = vpack.c.bf16 %v1284_v56, %v1283_v28 }
 0x157   : > { %1844 = vst [vmem:[%s2470_s30 + $0x78] sm:$0xff] %v1828_v54  }
 0x158   : > { %1843 = vst [vmem:[%s2470_s30 + $0x70] sm:$0xff] %v1823_v59  }
 0x159   : > { %2175 = shalt.err (!%p2172_p5)
}
 0x15a   : > { %s2176_s14 = scalar_lea.hbm %s2548_s9, 2048  ;;  %s2180_s24 = scalar_lea.hbm %s2606_s4, 4096 }
 0x15b   : > { %p2177_p6 = scmp.ne.s32.totalorder %s2548_s9, %s2176_s14  ;;  %p2181_p10 = scmp.lt.u32.totalorder %s2548_s9, %s2606_s4 }
 0x15c   : > { %p2182_p11 = scmp.lt.u32.totalorder %s2180_s24, %s2176_s14  ;;  %p2184_p13 = scmp.lt.u32.totalorder %s2176_s14, %s2548_s9 }
 0x15d   : > { %p2178_p7 = pnand %p2177_p6, %p2310_p4 }
 0x15e   : > { %p2183_p12 = por %p2182_p11, %p2181_p10 }
 0x15f   : > { %p2179_p9 = pneg %p2178_p7 }
 0x160   : > { %p2185_p0 = por %p2184_p13, %p2183_p12 }
 0x162   : > { %p2186_p1 = pnand %p2185_p0, %p2179_p9 }
 0x164   : > { %2189 = shalt.err (!%p2186_p1)
}
 0x165   : > { %s2243_s30 = smov 64   ;;  %s2244_s5 = smov 4  }
 0x166   : > { %2069 = dma.vmem_to_hbm [thread:$0]  (%p2310_p4), %s2550_s6, 2048, %s2548_s9, %s2556_s18, %s2243_s30, %s2243_s30, %s2244_s5  }
 0x167 PF: > { %p2075_p2 = scmp.ge.s32.totalorder %s2240_s20, 2  ;;  %s1479_s7 = sand.u32 1, %s2220_s15  }
 0x168   : > { %s1480_s8 = scalar_lea.sflag [#allocation3], %s1479_s7 }
 0x169   : > { %p2072_p3 = pnand %p2075_p2, %p2317_p8 }
 0x16b   : > { %2215 = dma.done.wait (!%p2072_p3), %s1480_s8, 2048  }
 0x16c   : > { %2217 = vsyncadd (!%p2072_p3), %s1480_s8, 4294965248  ;;  %s17_s20 = sadd.s32 1, %s2240_s20   ;;  %s2609_s15 = smov %s2224_s16 }
 0x16d   : > { %p14_p5 = scmp.ge.s32.totalorder %s17_s20, 4   ;;  %s2610_s16 = smov %s2228_s17 }
 0x16e   : > { %s2611_s17 = smov %s2323_s28  ;;  %s2612_s18 = smov %s2236_s19 }
 0x16f   : > { %s2613_s19 = smov %s2615_s23  ;;  %16 = sbr.rel (!%p14_p5) target bundleno = 4 (0x4), region = 82 }
 0x176   :  { %1485 = vsyncpa [#allocation3], 1 }
 0x177   :  { %1487 = vsyncpa [#allocation3 + $0x1], 1 }

</bundles_post_ra>
